<compile_context>
chip_gen: v7x
topology: tpu7x:2x2x1
jax: 0.10.0
libtpu: 0.0.40
codegen_flags: <defaults>
</compile_context>

<pallas_src>
import functools

import jax
import jax.numpy as jnp
from jax import lax
from jax.experimental import pallas as pl
from jax.experimental.pallas import tpu as pltpu


_LANE_WIDTHS = (1024, 512, 256, 128)      # lane-dense slab widths (multiples of 128)
_ACC_ELEMS = 8 * 1024                     # accumulator block = 8 vregs of f32
_DEFAULT_TILE_BYTES = 4 * 1024 * 1024     # per input per pipeline buffer


def _chip_has_two_tensorcores():
    """Best-effort: True only on chips with 2 TensorCores per device (v7x)."""
    try:
        kind = jax.devices()[0].device_kind.lower()
    except Exception:  # defensive: never let detection break the kernel
        return False
    # v5e / v6e are single-TensorCore; only enable the core split where it can
    # actually shard (v7x).  v4/v5p megacore intentionally stays single-core.
    return "v7" in kind


def _dice_kernel(x_ref, t_ref, num_ref, den_ref, acc_xt, acc_den, *,
                 tiles_per_core, total_tiles, acc_rows, n_chunks,
                 last_full, last_rem, ragged, need_guard):
    p = pl.program_id(0)
    j = pl.program_id(1)
    tile_idx = p * tiles_per_core + j
    lane_c = x_ref.shape[1]

    @pl.when(j == 0)
    def _init():
        acc_xt[...] = jnp.zeros_like(acc_xt)
        acc_den[...] = jnp.zeros_like(acc_den)

    def load_chunk(r0):
        xc = x_ref[pl.ds(r0, acc_rows), :].astype(jnp.float32)
        tc = t_ref[pl.ds(r0, acc_rows), :].astype(jnp.float32)
        return xc, tc

    def accumulate(n_full, rem):
        # `n_full` unmasked (acc_rows, lane_c) chunks, then (optionally) one
        # partial chunk with only `rem` valid rows.  Both are static Python
        # ints, so the steady state has NO masking work and the partial sums
        # live in vregs across the inner loop (one small VMEM += per step).
        zero = jnp.zeros((acc_rows, lane_c), jnp.float32)
        carry = (zero, zero)

        def body(c, carry):
            axt, aden = carry
            r0 = pl.multiple_of(c * acc_rows, acc_rows)
            xc, tc = load_chunk(r0)
            return axt + xc * tc, aden + (xc + tc)

        if n_full > 0:
            unroll = next(u for u in (4, 2, 1) if n_full % u == 0)
            carry = lax.fori_loop(0, n_full, body, carry, unroll=unroll)

        if rem > 0:
            axt, aden = carry
            xc, tc = load_chunk(n_full * acc_rows)
            keep = lax.broadcasted_iota(jnp.int32, (acc_rows, lane_c), 0) < rem
            xc = jnp.where(keep, xc, 0.0)
            tc = jnp.where(keep, tc, 0.0)
            carry = (axt + xc * tc, aden + (xc + tc))

        axt, aden = carry
        acc_xt[...] += axt
        acc_den[...] += aden        # fused sum(x) + sum(t)

    if total_tiles == 1:
        accumulate(last_full, last_rem)
    elif not ragged:
        if need_guard:
            pl.when(tile_idx < total_tiles)(lambda: accumulate(n_chunks, 0))
        else:
            accumulate(n_chunks, 0)
    else:
        # Unmasked fast path for every steady tile; the masked partial chunk
        # exists only on the single last tile.  Clamped duplicate steps
        # (tile_idx >= total_tiles, only with an uneven core split) fall
        # through both branches and accumulate nothing.
        pl.when(tile_idx < total_tiles - 1)(lambda: accumulate(n_chunks, 0))
        pl.when(tile_idx == total_tiles - 1)(
            lambda: accumulate(last_full, last_rem))

    @pl.when(j == pl.num_programs(1) - 1)
    def _finalize():
        # Single cross-lane/sublane reduction per core over the tiny 8-vreg
        # accumulators, once at the end of the grid.
        num_ref[...] = jnp.sum(acc_xt[...], keepdims=True).reshape(num_ref.shape)
        den_ref[...] = jnp.sum(acc_den[...], keepdims=True).reshape(den_ref.shape)


def dice_loss(x, target, gamma=0.3, smooth=0.0, eps=1e-7, *,
              _tile_bytes=None, _force_cores=None):
    """Pallas DiceLoss forward. `gamma` is unused in forward (matches PyTorch)."""
    assert x.shape == target.shape
    del gamma  # not used by the PyTorch forward pass

    xf = x.reshape(-1)           # free reshape, keep original dtype
    tf = target.reshape(-1)
    n = int(xf.size)

    # Degenerate tiny inputs: pad up to one full 128-lane row (sum-neutral).
    if n < 128:
        xf = jnp.pad(xf, (0, 128 - n))
        tf = jnp.pad(tf, (0, 128 - n))
        n = 128

    # Main slab handled by the kernel.  If numel % 128 != 0, the (<128 element)
    # tail is summed in the wrapper instead of jnp.pad-copying both inputs.
    tail = n % 128
    n_main = n - tail
    lane_c = next(c for c in _LANE_WIDTHS if n_main % c == 0)
    rows = n_main // lane_c

    # Accumulator chunk: 8 vregs (8192 f32 elements) regardless of lane width.
    acc_rows = max(8, _ACC_ELEMS // lane_c)

    # Tile size in BYTES of the input dtype (bf16 tiles hold 2x the elements).
    tile_bytes = _DEFAULT_TILE_BYTES if _tile_bytes is None else int(_tile_bytes)
    chunk_bytes = acc_rows * lane_c * xf.dtype.itemsize
    want_chunks = max(1, tile_bytes // chunk_bytes)
    need_chunks = int(pl.cdiv(rows, acc_rows))
    n_chunks = int(min(want_chunks, need_chunks))
    tile_rows = n_chunks * acc_rows

    total_tiles = int(pl.cdiv(rows, tile_rows))
    last_rows = rows - (total_tiles - 1) * tile_rows      # in [1, tile_rows]
    last_full = last_rows // acc_rows
    last_rem = last_rows % acc_rows
    ragged = (last_rows != tile_rows)

    # TensorCore split: only where it can actually shard (2-TC chips).
    if _force_cores is not None:
        n_cores = max(1, min(int(_force_cores), total_tiles))
        core_sem = pltpu.ARBITRARY            # test/serial mode
    elif _chip_has_two_tensorcores() and total_tiles >= 2:
        n_cores = 2
        core_sem = getattr(pltpu, "CORE_PARALLEL", pltpu.PARALLEL)
    else:
        n_cores = 1
        core_sem = pltpu.ARBITRARY
    tiles_per_core = int(pl.cdiv(total_tiles, n_cores))
    need_guard = (n_cores * tiles_per_core != total_tiles)

    kernel = functools.partial(
        _dice_kernel,
        tiles_per_core=tiles_per_core,
        total_tiles=total_tiles,
        acc_rows=acc_rows,
        n_chunks=n_chunks,
        last_full=last_full,
        last_rem=last_rem,
        ragged=ragged,
        need_guard=need_guard,
    )

    if need_guard:
        def in_map(p, j):
            # Clamp so the DMA'd block index is always in range; the in-kernel
            # guard skips the (single) clamped duplicate step.
            return (jnp.minimum(p * tiles_per_core + j, total_tiles - 1), 0)
    else:
        def in_map(p, j):
            return (p * tiles_per_core + j, 0)

    x_main = (xf if tail == 0 else xf[:n_main]).reshape(rows, lane_c)
    t_main = (tf if tail == 0 else tf[:n_main]).reshape(rows, lane_c)

    num_parts, den_parts = pl.pallas_call(
        kernel,
        out_shape=(jax.ShapeDtypeStruct((n_cores, 1, 1), jnp.float32),
                   jax.ShapeDtypeStruct((n_cores, 1, 1), jnp.float32)),
        grid_spec=pltpu.PrefetchScalarGridSpec(
            num_scalar_prefetch=0,
            grid=(n_cores, tiles_per_core),
            in_specs=[
                pl.BlockSpec((tile_rows, lane_c), in_map),
                pl.BlockSpec((tile_rows, lane_c), in_map),
            ],
            out_specs=[
                pl.BlockSpec((1, 1, 1), lambda p, j: (p, 0, 0)),
                pl.BlockSpec((1, 1, 1), lambda p, j: (p, 0, 0)),
            ],
            scratch_shapes=[
                pltpu.VMEM((acc_rows, lane_c), jnp.float32),
                pltpu.VMEM((acc_rows, lane_c), jnp.float32),
            ],
        ),
        compiler_params=pltpu.CompilerParams(
            dimension_semantics=(core_sem, pltpu.ARBITRARY),
            vmem_limit_bytes=32 * 1024 * 1024,
        ),
    )(x_main, t_main)

    inter = jnp.sum(num_parts)
    sums = jnp.sum(den_parts)
    if tail:
        x_tail = xf[n_main:].astype(jnp.float32)
        t_tail = tf[n_main:].astype(jnp.float32)
        inter = inter + jnp.sum(x_tail * t_tail)
        sums = sums + jnp.sum(x_tail) + jnp.sum(t_tail)

    # NOTE: with smooth=0 and zero intersection this is log(0) = -inf, matching
    # the PyTorch reference semantics.
    return jnp.log((2.0 * inter + smooth) / (sums + smooth + eps))


def dice_loss_ref(x, target, smooth=0.0, eps=1e-7):
    xf = x.astype(jnp.float32)
    tf = target.astype(jnp.float32)
    return jnp.log((2.0 * jnp.sum(xf * tf) + smooth)
                   / (jnp.sum(xf) + jnp.sum(tf) + smooth + eps))


if __name__ == "__main__":
    key = jax.random.PRNGKey(0)

    # Primary small NCHW case plus shapes/options that exercise the ragged-tail
    # wrapper path, bf16 inputs with the long inner chunk loop, and the
    # multi-tile / guarded 2-way core-split bookkeeping (forced, serial-safe).
    cases = [
        ((2, 4, 16, 16), jnp.float32, {}),                  # required small case
        ((1, 3, 7, 11), jnp.float32, {}),                   # numel % 128 != 0 tail
        ((4, 16, 128, 128), jnp.bfloat16, {}),              # bf16, 128-chunk tile
        ((4, 8, 96, 100), jnp.float32,                      # multi-tile + guard
         dict(_tile_bytes=96 * 1024, _force_cores=2)),
    ]

    ok = True
    for idx, (shape, dtype, opts) in enumerate(cases):
        k1, k2 = jax.random.split(jax.random.fold_in(key, idx))
        xin = jax.nn.sigmoid(jax.random.normal(k1, shape, jnp.float32)).astype(dtype)
        tgt = (jax.random.uniform(k2, shape) > 0.5).astype(dtype)

        loss = jax.block_until_ready(dice_loss(xin, tgt, **opts))
        ref = dice_loss_ref(xin, tgt)
        if not jnp.allclose(loss, ref, rtol=2e-3, atol=1e-5):
            ok = False
            print("MISMATCH", shape, dtype, float(loss), float(ref))

    assert ok
    print("KERNEL_OK")
</pallas_src>

<mosaic_0001>
module attributes {stable_mosaic.version = 11 : i64} {
  func.func @_dice_kernel(%arg0: i32, %arg1: i32, %arg2: memref<8x1024xf32, #tpu.memory_space<vmem>>, %arg3: memref<8x1024xf32, #tpu.memory_space<vmem>>, %arg4: memref<1x1x1xf32, #tpu.memory_space<vmem>>, %arg5: memref<1x1x1xf32, #tpu.memory_space<vmem>>, %arg6: memref<8x1024xf32, #tpu.memory_space<vmem>>, %arg7: memref<8x1024xf32, #tpu.memory_space<vmem>>) attributes {dimension_semantics = [#tpu.dimension_semantics<arbitrary>, #tpu.dimension_semantics<arbitrary>], iteration_bounds = array<i64: 1, 1>, scalar_prefetch = 0 : i64, scratch_operands = 2 : i64, tpu.core_type = #tpu.core_type<tc>, window_params = [{transform_indices = @transform_0, window_bounds = array<i64: 8, 1024>}, {transform_indices = @transform_1, window_bounds = array<i64: 8, 1024>}, {transform_indices = @transform_2, window_bounds = array<i64: 1, 1, 1>}, {transform_indices = @transform_3, window_bounds = array<i64: 1, 1, 1>}]} {
    %c0_i32 = arith.constant 0 : i32
    %0 = arith.cmpi eq, %arg1, %c0_i32 : i32
    %1 = arith.extui %0 : i1 to i32
    %c0_i32_0 = arith.constant 0 : i32
    %2 = arith.cmpi ne, %1, %c0_i32_0 : i32
    scf.if %2 {
      %cst_16 = arith.constant 0.000000e+00 : f32
      %26 = vector.broadcast %cst_16 : f32 to vector<8x1024xf32>
      %c0_17 = arith.constant 0 : index
      %c0_18 = arith.constant 0 : index
      %27 = vector.load %arg6[%c0_17, %c0_18] : memref<8x1024xf32, #tpu.memory_space<vmem>>, vector<8x1024xf32>
      tpu.vector_store %arg6[%c0_17, %c0_18], %26 {strides = array<i32>} : memref<8x1024xf32, #tpu.memory_space<vmem>>, vector<8x1024xf32>,
      %cst_19 = arith.constant 0.000000e+00 : f32
      %28 = vector.broadcast %cst_19 : f32 to vector<8x1024xf32>
      %c0_20 = arith.constant 0 : index
      %c0_21 = arith.constant 0 : index
      %29 = vector.load %arg7[%c0_20, %c0_21] : memref<8x1024xf32, #tpu.memory_space<vmem>>, vector<8x1024xf32>
      tpu.vector_store %arg7[%c0_20, %c0_21], %28 {strides = array<i32>} : memref<8x1024xf32, #tpu.memory_space<vmem>>, vector<8x1024xf32>,
    } else {
    }
    %cst = arith.constant 0.000000e+00 : f32
    %3 = vector.broadcast %cst : f32 to vector<8x1024xf32>
    %c0 = arith.constant 0 : index
    %c0_1 = arith.constant 0 : index
    %4 = vector.load %arg2[%c0, %c0_1] : memref<8x1024xf32, #tpu.memory_space<vmem>>, vector<8x1024xf32>
    %c0_2 = arith.constant 0 : index
    %c0_3 = arith.constant 0 : index
    %5 = vector.load %arg3[%c0_2, %c0_3] : memref<8x1024xf32, #tpu.memory_space<vmem>>, vector<8x1024xf32>
    %6 = tpu.iota {dimensions = array<i32: 0>} : vector<8x1024xi32>
    %c2_i32 = arith.constant 2 : i32
    %7 = vector.broadcast %c2_i32 : i32 to vector<8x1024xi32>
    %8 = arith.cmpi slt, %6, %7 : vector<8x1024xi32>
    %cst_4 = arith.constant 0.000000e+00 : f32
    %9 = vector.broadcast %cst_4 : f32 to vector<8x1024xf32>
    %10 = arith.select %8, %4, %9 : vector<8x1024xi1>, vector<8x1024xf32>
    %cst_5 = arith.constant 0.000000e+00 : f32
    %11 = vector.broadcast %cst_5 : f32 to vector<8x1024xf32>
    %12 = arith.select %8, %5, %11 : vector<8x1024xi1>, vector<8x1024xf32>
    %13 = arith.mulf %10, %12 : vector<8x1024xf32>
    %14 = arith.addf %3, %13 : vector<8x1024xf32>
    %15 = arith.addf %10, %12 : vector<8x1024xf32>
    %16 = arith.addf %3, %15 : vector<8x1024xf32>
    %c0_6 = arith.constant 0 : index
    %c0_7 = arith.constant 0 : index
    %17 = vector.load %arg6[%c0_6, %c0_7] : memref<8x1024xf32, #tpu.memory_space<vmem>>, vector<8x1024xf32>
    %18 = arith.addf %17, %14 : vector<8x1024xf32>
    %c0_8 = arith.constant 0 : index
    %c0_9 = arith.constant 0 : index
    %19 = vector.load %arg6[%c0_8, %c0_9] : memref<8x1024xf32, #tpu.memory_space<vmem>>, vector<8x1024xf32>
    tpu.vector_store %arg6[%c0_8, %c0_9], %18 {strides = array<i32>} : memref<8x1024xf32, #tpu.memory_space<vmem>>, vector<8x1024xf32>,
    %c0_10 = arith.constant 0 : index
    %c0_11 = arith.constant 0 : index
    %20 = vector.load %arg7[%c0_10, %c0_11] : memref<8x1024xf32, #tpu.memory_space<vmem>>, vector<8x1024xf32>
    %21 = arith.addf %20, %16 : vector<8x1024xf32>
    %c0_12 = arith.constant 0 : index
    %c0_13 = arith.constant 0 : index
    %22 = vector.load %arg7[%c0_12, %c0_13] : memref<8x1024xf32, #tpu.memory_space<vmem>>, vector<8x1024xf32>
    tpu.vector_store %arg7[%c0_12, %c0_13], %21 {strides = array<i32>} : memref<8x1024xf32, #tpu.memory_space<vmem>>, vector<8x1024xf32>,
    %c0_i32_14 = arith.constant 0 : i32
    %23 = arith.cmpi eq, %arg1, %c0_i32_14 : i32
    %24 = arith.extui %23 : i1 to i32
    %c0_i32_15 = arith.constant 0 : i32
    %25 = arith.cmpi ne, %24, %c0_i32_15 : i32
    scf.if %25 {
      %c0_16 = arith.constant 0 : index
      %c0_17 = arith.constant 0 : index
      %26 = vector.load %arg6[%c0_16, %c0_17] : memref<8x1024xf32, #tpu.memory_space<vmem>>, vector<8x1024xf32>
      %27 = vector.shape_cast %26 : vector<8x1024xf32> to vector<1x8x1024xf32>
      %cst_18 = arith.constant dense<0.000000e+00> : vector<1xf32>
      %28 = vector.multi_reduction <add>, %27, %cst_18 [1, 2] : vector<1x8x1024xf32> to vector<1xf32>
      %29 = vector.shape_cast %28 : vector<1xf32> to vector<1x1x1xf32>
      %30 = vector.extract %29[0, 0, 0] : f32 from vector<1x1x1xf32>
      %31 = vector.broadcast %30 : f32 to vector<1x1xf32>
      %32 = vector.shape_cast %31 : vector<1x1xf32> to vector<1x1x1xf32>
      %c0_19 = arith.constant 0 : index
      %c0_20 = arith.constant 0 : index
      %c0_21 = arith.constant 0 : index
      %33 = vector.load %arg4[%c0_19, %c0_20, %c0_21] : memref<1x1x1xf32, #tpu.memory_space<vmem>>, vector<1x1x1xf32>
      tpu.vector_store %arg4[%c0_19, %c0_20, %c0_21], %32 {strides = array<i32>} : memref<1x1x1xf32, #tpu.memory_space<vmem>>, vector<1x1x1xf32>,
      %c0_22 = arith.constant 0 : index
      %c0_23 = arith.constant 0 : index
      %34 = vector.load %arg7[%c0_22, %c0_23] : memref<8x1024xf32, #tpu.memory_space<vmem>>, vector<8x1024xf32>
      %35 = vector.shape_cast %34 : vector<8x1024xf32> to vector<1x8x1024xf32>
      %cst_24 = arith.constant dense<0.000000e+00> : vector<1xf32>
      %36 = vector.multi_reduction <add>, %35, %cst_24 [1, 2] : vector<1x8x1024xf32> to vector<1xf32>
      %37 = vector.shape_cast %36 : vector<1xf32> to vector<1x1x1xf32>
      %38 = vector.extract %37[0, 0, 0] : f32 from vector<1x1x1xf32>
      %39 = vector.broadcast %38 : f32 to vector<1x1xf32>
      %40 = vector.shape_cast %39 : vector<1x1xf32> to vector<1x1x1xf32>
      %c0_25 = arith.constant 0 : index
      %c0_26 = arith.constant 0 : index
      %c0_27 = arith.constant 0 : index
      %41 = vector.load %arg5[%c0_25, %c0_26, %c0_27] : memref<1x1x1xf32, #tpu.memory_space<vmem>>, vector<1x1x1xf32>
      tpu.vector_store %arg5[%c0_25, %c0_26, %c0_27], %40 {strides = array<i32>} : memref<1x1x1xf32, #tpu.memory_space<vmem>>, vector<1x1x1xf32>,
    } else {
    }
    return
  }
  func.func @transform_0(%arg0: i32, %arg1: i32) -> (i32, i32) {
    %c1_i32 = arith.constant 1 : i32
    %0 = arith.muli %arg0, %c1_i32 : i32
    %1 = arith.addi %0, %arg1 : i32
    %c0_i32 = arith.constant 0 : i32
    %c0_i32_0 = arith.constant 0 : i32
    return %1, %c0_i32 : i32, i32
  }
  func.func @transform_1(%arg0: i32, %arg1: i32) -> (i32, i32) {
    %c1_i32 = arith.constant 1 : i32
    %0 = arith.muli %arg0, %c1_i32 : i32
    %1 = arith.addi %0, %arg1 : i32
    %c0_i32 = arith.constant 0 : i32
    %c0_i32_0 = arith.constant 0 : i32
    return %1, %c0_i32 : i32, i32
  }
  func.func @transform_2(%arg0: i32, %arg1: i32) -> (i32, i32, i32) {
    %c0_i32 = arith.constant 0 : i32
    %c0_i32_0 = arith.constant 0 : i32
    %c0_i32_1 = arith.constant 0 : i32
    return %arg0, %c0_i32, %c0_i32_0 : i32, i32, i32
  }
  func.func @transform_3(%arg0: i32, %arg1: i32) -> (i32, i32, i32) {
    %c0_i32 = arith.constant 0 : i32
    %c0_i32_0 = arith.constant 0 : i32
    %c0_i32_1 = arith.constant 0 : i32
    return %arg0, %c0_i32, %c0_i32_0 : i32, i32, i32
  }
}

</mosaic_0001>

<bundles_post_ra>
// kernel: tpu_custom_call.1
= control target key start
LH: loop header
LB: loop body
LE: loop exit
PB: predicated region body
PF: predicated region fallthrough
CT: control target
= control target key end

     0   :  { %9 = vsyncpa [#allocation5], 0  ;;  %s714_s0 = inlined_call_operand.hbm [shape: f32[2,1024], index: 0, kind: input, shape index: {}]   ;;  %s715_s1 = inlined_call_operand.hbm [shape: f32[2,1024], index: 1, kind: input, shape index: {}]   ;;  %s716_s2 = inlined_call_operand.hbm [shape: f32[1,1,1], index: 2, kind: output, shape index: {0}]   ;;  %s717_s3 = inlined_call_operand.hbm [shape: f32[1,1,1], index: 3, kind: output, shape index: {1}]  }
   0x1   :  { %10 = vsyncpa [#allocation8], 0 }
   0x2   :  { %11 = vsyncpa [#allocation6], 0 }
   0x3   :  { %12 = vsyncpa [#allocation11], 0 }
   0x4   :  { %22 = vsyncadd [#allocation5], 768  ;;  %s601_s12 = smov [#allocation4]   ;;  %s505_s16 = scalar_lea.hbm %s714_s0, 256 }
   0x5   :  { %s28_s13 = sshll.u32 %s601_s12, 4  ;;  %p506_p0 = scmp.ne.s32.totalorder %s714_s0, %s505_s16  ;;  %s29_s13 = int_to_ptr.vmem [resolvable:$true] %s28_s13 }
   0x6   :  { %p509_p1 = scmp.lt.u32.totalorder %s505_s16, %s714_s0 }
   0x8   :  { %p511_p2 = pnand %p509_p1, %p506_p0 }
   0xa   :  { %514 = shalt.err (!%p511_p2)
}
   0xb   :  { %s515_s21 = scalar_lea.vmem %s29_s13, 256  ;;  %s519_s22 = scalar_lea.vmem %s29_s13, 1024 }
   0xc   :  { %p516_p3 = scmp.ne.s32.totalorder %s29_s13, %s515_s21  ;;  %p520_p4 = scmp.lt.s32.totalorder %s29_s13, %s29_s13 }
   0xd   :  { %p521_p5 = scmp.lt.s32.totalorder %s519_s22, %s515_s21 }
   0xf   :  { %p522_p6 = por %p521_p5, %p520_p4 }
  0x11   :  { %p523_p7 = pnand %p522_p6, %p516_p3 }
  0x13   :  { %526 = shalt.err (!%p523_p7)
}
  0x14   :  { %s602_s23 = smov 256   ;;  %s603_s24 = smov 16  }
  0x15   :  { %34 = dma.hbm_to_vmem [thread:$0]  %s714_s0, 256, %s29_s13, [#allocation5], %s602_s23, %s602_s23, %s603_s24  }
  0x16   :  { %44 = vsyncadd [#allocation8], 768  ;;  %s604_s27 = smov [#allocation7]   ;;  %s527_s4 = scalar_lea.hbm %s715_s1, 256 }
  0x17   :  { %s50_s28 = sshll.u32 %s604_s27, 4  ;;  %p528_p8 = scmp.ne.s32.totalorder %s715_s1, %s527_s4  ;;  %s51_s28 = int_to_ptr.vmem [resolvable:$true] %s50_s28 }
  0x18   :  { %p531_p9 = scmp.lt.u32.totalorder %s527_s4, %s715_s1 }
  0x1a   :  { %p533_p10 = pnand %p531_p9, %p528_p8 }
  0x1c   :  { %536 = shalt.err (!%p533_p10)
}
  0x1d   :  { %s537_s9 = scalar_lea.vmem %s51_s28, 256  ;;  %s541_s0 = scalar_lea.vmem %s51_s28, 1024 }
  0x1e   :  { %p538_p11 = scmp.ne.s32.totalorder %s51_s28, %s537_s9  ;;  %p542_p12 = scmp.lt.s32.totalorder %s51_s28, %s51_s28 }
  0x1f   :  { %p543_p13 = scmp.lt.s32.totalorder %s541_s0, %s537_s9 }
  0x21   :  { %p544_p0 = por %p543_p13, %p542_p12 }
  0x23   :  { %p545_p1 = pnand %p544_p0, %p538_p11 }
  0x25   :  { %548 = shalt.err (!%p545_p1)
}
  0x26   :  { %56 = dma.hbm_to_vmem [thread:$0]  %s715_s1, 256, %s51_s28, [#allocation8], %s602_s23, %s602_s23, %s603_s24  }
  0x27   :  { %593 = dma.done.wait [#allocation5], 1024  }
  0x28   :  { %594 = vsyncadd [#allocation5], 4294966272 }
  0x29   :  { %595 = dma.done.wait [#allocation8], 1024  }
  0x2a   :  { %596 = vsyncadd [#allocation8], 4294966272  ;;  %v109_v0 = vlaneseq  ;;  %v605_v1 = vmov 1983009808   ;;  %v481_v6 = vld [vmem:[#allocation4] ss:$16 sps:$4 sm:$0xff]  }
  0x2b   :  { %v125_v2 = vunpack.c.l.s4 %v605_v1  ;;  %v483_v7 = vld [vmem:[#allocation4 + $0x4] ss:$16 sps:$4 sm:$0xff]   ;;  %v484_v8 = vld [vmem:[#allocation4 + $0x20] ss:$16 sps:$4 sm:$0xff]   ;;  %v487_v10 = vld [vmem:[#allocation4 + $0x8] ss:$16 sps:$4 sm:$0xff]  }
  0x2c   :  { %v652_v3 = vshrl.u32 %v109_v0, 7  ;;  %v486_v9 = vld [vmem:[#allocation4 + $0x24] ss:$16 sps:$4 sm:$0xff]   ;;  %v490_v13 = vld [vmem:[#allocation4 + $0x28] ss:$16 sps:$4 sm:$0xff]   ;;  %s606_s1 = smov [#allocation9]  }
  0x2d   :  { %v126_v4 = vunpack.c.0.s8 %v125_v2  ;;  %v489_v16 = vld [vmem:[#allocation4 + $0xc] ss:$16 sps:$4 sm:$0xff]   ;;  %v493_v20 = vld [vmem:[#allocation7] ss:$16 sps:$4 sm:$0xff]   ;;  %v495_v22 = vld [vmem:[#allocation7 + $0x4] ss:$16 sps:$4 sm:$0xff]  }
  0x2e   :  { %vm111_vm0 = vcmp.lt.s32.totalorder %v652_v3, 2  ;;  %v492_v17 = vld [vmem:[#allocation4 + $0x2c] ss:$16 sps:$4 sm:$0xff]   ;;  %v496_v23 = vld [vmem:[#allocation7 + $0x20] ss:$16 sps:$4 sm:$0xff]   ;;  %s446_s12 = sshll.u32 %s606_s1, 4  ;;  %s447_s12 = int_to_ptr.vmem [resolvable:$true] %s446_s12 }
  0x2f   :  { %v129_v5 = vsub.s32 %v126_v4, %v652_v3  ;;  %v498_v24 = vld [vmem:[#allocation7 + $0x24] ss:$16 sps:$4 sm:$0xff]   ;;  %v499_v27 = vld [vmem:[#allocation7 + $0x8] ss:$16 sps:$4 sm:$0xff]   ;;  %v501_v34 = vld [vmem:[#allocation7 + $0xc] ss:$16 sps:$4 sm:$0xff]   ;;  %p554_p3 = scmp.lt.s32.totalorder %s447_s12, %s447_s12 }
  0x30   :  { %v502_v28 = vld [vmem:[#allocation7 + $0x28] ss:$16 sps:$4 sm:$0xff]   ;;  %v504_v35 = vld [vmem:[#allocation7 + $0x2c] ss:$16 sps:$4 sm:$0xff]   ;;  %vm412_vm1 = vcmask 0   ;;  %s607_s14 = smov [#allocation10]  }
  0x31   :  { %v130_v11 = vrot.slane %v481_v6, %v129_v5  ;;  %v137_v12 = vrot.slane %v483_v7, %v129_v5  ;;  %v144_v14 = vrot.slane %v484_v8, %v129_v5  ;;  %v151_v15 = vrot.slane %v486_v9, %v129_v5  ;;  %s456_s15 = sshll.u32 %s607_s14, 4  ;;  %s549_s16 = scalar_lea.vmem %s447_s12, 16  ;;  %s457_s15 = int_to_ptr.vmem [resolvable:$true] %s456_s15 }
  0x32   :  { %v166_v18 = vrot.slane %v487_v10, %v129_v5  ;;  %v180_v19 = vrot.slane %v490_v13, %v129_v5  ;;  %v173_v29 = vrot.slane %v489_v16, %v129_v5  ;;  %v187_v31 = vrot.slane %v492_v17, %v129_v5  ;;  %p550_p2 = scmp.ne.s32.totalorder %s447_s12, %s549_s16  ;;  %s553_s17 = scalar_lea.vmem %s447_s12, 32 }
  0x33   :  { %v152_v21 = vcombine.low %v130_v11, %v144_v14  ;;  %v153_v25 = vcombine.high %v130_v11, %v144_v14  ;;  %v154_v26 = vcombine.low %v137_v12, %v151_v15  ;;  %v155_v30 = vcombine.high %v137_v12, %v151_v15  ;;  %p555_p4 = scmp.lt.s32.totalorder %s553_s17, %s549_s16 }
  0x34   :  { %v188_v32 = vcombine.low %v166_v18, %v180_v19  ;;  %v226_v36 = vrot.slane %v493_v20, %v129_v5  ;;  %v233_v37 = vrot.slane %v495_v22, %v129_v5  ;;  %v240_v38 = vrot.slane %v496_v23, %v129_v5 }
  0x35   :  { %v200_v33 = vsel %vm111_vm0, %v152_v21, 0.0  ;;  %v247_v39 = vrot.slane %v498_v24, %v129_v5  ;;  %v201_v40 = vsel %vm111_vm0, %v153_v25, 0.0  ;;  %v202_v41 = vsel %vm111_vm0, %v154_v26, 0.0  ;;  %p556_p5 = por %p555_p4, %p554_p3 }
  0x36   :  { %v262_v42 = vrot.slane %v499_v27, %v129_v5  ;;  %v276_v43 = vrot.slane %v502_v28, %v129_v5  ;;  %v248_v44 = vcombine.low %v226_v36, %v240_v38  ;;  %v249_v45 = vcombine.high %v226_v36, %v240_v38 }
  0x37   :  { %v250_v46 = vcombine.low %v233_v37, %v247_v39  ;;  %v251_v47 = vcombine.high %v233_v37, %v247_v39  ;;  %v203_v48 = vsel %vm111_vm0, %v155_v30, 0.0  ;;  %v269_v49 = vrot.slane %v501_v34, %v129_v5  ;;  %p557_p6 = pnand %p556_p5, %p550_p2 }
  0x38   :  { %v283_v50 = vrot.slane %v504_v35, %v129_v5  ;;  %v284_v51 = vcombine.low %v262_v42, %v276_v43  ;;  %v296_v52 = vsel %vm111_vm0, %v248_v44, 0.0  ;;  %v297_v53 = vsel %vm111_vm0, %v249_v45, 0.0 }
  0x39   :  { %v298_v54 = vsel %vm111_vm0, %v250_v46, 0.0  ;;  %v299_v55 = vsel %vm111_vm0, %v251_v47, 0.0  ;;  %v189_v56 = vcombine.high %v166_v18, %v180_v19  ;;  %v285_v57 = vcombine.high %v262_v42, %v276_v43 }
  0x3a   :  { %v190_v58 = vcombine.low %v173_v29, %v187_v31  ;;  %v304_v59 = vmul.f32 %v296_v52, %v200_v33  ;;  %v305_v60 = vmul.f32 %v297_v53, %v201_v40  ;;  %v306_v61 = vmul.f32 %v298_v54, %v202_v41 }
  0x3b   :  { %v204_v62 = vsel %vm111_vm0, %v188_v32, 0.0  ;;  %v286_v63 = vcombine.low %v269_v49, %v283_v50  ;;  %v300_v0 = vsel %vm111_vm0, %v284_v51, 0.0  ;;  %v307_v1 = vmul.f32 %v299_v55, %v203_v48 }
  0x3c   :  { %v395_v2 = vadd.f32 %v305_v60, %v304_v59  ;;  %v320_v4 = vadd.f32 %v296_v52, %v200_v33  ;;  %v321_v5 = vadd.f32 %v297_v53, %v201_v40  ;;  %v322_v6 = vadd.f32 %v298_v54, %v202_v41 }
  0x3d   :  { %v191_v7 = vcombine.high %v173_v29, %v187_v31  ;;  %v205_v8 = vsel %vm111_vm0, %v189_v56, 0.0  ;;  %v287_v9 = vcombine.high %v269_v49, %v283_v50  ;;  %v301_v10 = vsel %vm111_vm0, %v285_v57, 0.0 }
  0x3e   :  { %v308_v11 = vmul.f32 %v300_v0, %v204_v62  ;;  %v396_v12 = vadd.f32 %v395_v2, %v306_v61  ;;  %v323_v13 = vadd.f32 %v299_v55, %v203_v48  ;;  %v422_v14 = vadd.f32 %v321_v5, %v320_v4 }
  0x3f   :  { %v206_v15 = vsel %vm111_vm0, %v190_v58, 0.0  ;;  %v302_v16 = vsel %vm111_vm0, %v286_v63, 0.0  ;;  %v309_v17 = vmul.f32 %v301_v10, %v205_v8  ;;  %v324_v19 = vadd.f32 %v300_v0, %v204_v62 }
  0x40   :  { %v397_v18 = vadd.f32 %v396_v12, %v307_v1  ;;  %v423_v20 = vadd.f32 %v422_v14, %v322_v6  ;;  %v207_v21 = vsel %vm111_vm0, %v191_v7, 0.0  ;;  %v303_v22 = vsel %vm111_vm0, %v287_v9, 0.0 }
  0x41   :  { %v310_v23 = vmul.f32 %v302_v16, %v206_v15  ;;  %v325_v25 = vadd.f32 %v301_v10, %v205_v8  ;;  %v311_v27 = vmul.f32 %v303_v22, %v207_v21  ;;  %v326_v29 = vadd.f32 %v302_v16, %v206_v15 }
  0x42   :  { %v398_v24 = vadd.f32 %v397_v18, %v308_v11  ;;  %v424_v26 = vadd.f32 %v423_v20, %v323_v13  ;;  %v327_v32 = vadd.f32 %v303_v22, %v207_v21 }
  0x44   :  { %v399_v28 = vadd.f32 %v398_v24, %v309_v17  ;;  %v425_v30 = vadd.f32 %v424_v26, %v324_v19 }
  0x46   :  { %v400_v31 = vadd.f32 %v399_v28, %v310_v23  ;;  %v426_v33 = vadd.f32 %v425_v30, %v325_v25 }
  0x48   :  { %v401_v34 = vadd.f32 %v400_v31, %v311_v27  ;;  %v427_v35 = vadd.f32 %v426_v33, %v326_v29 }
  0x4a   :  { %402 = vadd.xlane.f32.xlu0 %v401_v34  ;;  %v428_v36 = vadd.f32 %v427_v35, %v327_v32 }
  0x4e   :  { %429 = vadd.xlane.f32.xlu0 %v428_v36 }
  0xd7   :  { %v403_v37 = vpop.xlane.xlu0 %402 }
  0xd8   :  { %v404_v38 = vrot.slane %v403_v37, 4 }
  0xda   :  { %v405_v3 = vadd.f32 %v404_v38, %v403_v37 }
  0xdb   :  { %v430_v39 = vpop.xlane.xlu0 %429 }
  0xdc   :  { %v406_v40 = vrot.slane %v405_v3, 2  ;;  %v431_v41 = vrot.slane %v430_v39, 4 }
  0xde   :  { %v432_v42 = vadd.f32 %v431_v41, %v430_v39  ;;  %v407_v43 = vadd.f32 %v406_v40, %v405_v3 }
  0xe0   :  { %v433_v44 = vrot.slane %v432_v42, 2  ;;  %v408_v45 = vrot.slane %v407_v43, 1 }
  0xe2   :  { %v434_v46 = vadd.f32 %v433_v44, %v432_v42  ;;  %v409_v47 = vadd.f32 %v408_v45, %v407_v43 }
  0xe4   :  { %470 = vpush %v409_v47  ;;  %v435_v48 = vrot.slane %v434_v46, 1 }
  0xe6   :  { %v436_v49 = vadd.f32 %v435_v48, %v434_v46 }
  0xe8   :  { %472 = vpush %v436_v49 }
 0x115   :  { %s471_s13 = spop %470 }
 0x116   :  { %v411_v50 = vstv %s471_s13 }
 0x117   :  { %413 = vst.msk [vmem:[#allocation9] sm:$0x1] %vm412_vm1, %v411_v50 }
 0x118   :  { %560 = shalt.err (!%p557_p6)
}
 0x119   :  { %s561_s20 = scalar_lea.hbm %s716_s2, 16 }
 0x11a   :  { %p562_p7 = scmp.ne.s32.totalorder %s716_s2, %s561_s20  ;;  %p565_p8 = scmp.lt.u32.totalorder %s561_s20, %s716_s2 }
 0x11c   :  { %p567_p9 = pnand %p565_p8, %p562_p7 }
 0x11e   :  { %570 = shalt.err (!%p567_p9)
}
 0x11f   :  { %449 = dma.vmem_to_hbm [thread:$0]  %s447_s12, 16, %s716_s2, [#allocation6]  }
 0x120   :  { %s473_s27 = spop %472  ;;  %s571_s28 = scalar_lea.vmem %s457_s15, 16 }
 0x121   :  { %v438_v51 = vstv %s473_s27  ;;  %p572_p10 = scmp.ne.s32.totalorder %s457_s15, %s571_s28  ;;  %s575_s29 = scalar_lea.vmem %s457_s15, 32 }
 0x122   :  { %439 = vst.msk [vmem:[#allocation10] sm:$0x1] %vm412_vm1, %v438_v51  ;;  %p576_p11 = scmp.lt.s32.totalorder %s457_s15, %s457_s15  ;;  %p577_p12 = scmp.lt.s32.totalorder %s575_s29, %s571_s28 }
 0x124   :  { %p578_p13 = por %p577_p12, %p576_p11 }
 0x126   :  { %p579_p0 = pnand %p578_p13, %p572_p10 }
 0x128   :  { %582 = shalt.err (!%p579_p0)
}
 0x129   :  { %s583_s5 = scalar_lea.hbm %s717_s3, 16 }
 0x12a   :  { %p584_p1 = scmp.ne.s32.totalorder %s717_s3, %s583_s5  ;;  %p587_p2 = scmp.lt.u32.totalorder %s583_s5, %s717_s3 }
 0x12c   :  { %p589_p3 = pnand %p587_p2, %p584_p1 }
 0x12e   :  { %592 = shalt.err (!%p589_p3)
}
 0x12f   :  { %459 = dma.vmem_to_hbm [thread:$0]  %s457_s15, 16, %s717_s3, [#allocation11]  }
 0x130   :  { %597 = dma.done.wait [#allocation6], 16  }
 0x131   :  { %598 = vsyncadd [#allocation6], 4294967280 }
 0x132   :  { %599 = dma.done.wait [#allocation11], 16  }
 0x133   :  { %600 = vsyncadd [#allocation11], 4294967280 }
 0x134   :  { %466 = vsyncpa [#allocation5], 1 }
 0x135   :  { %467 = vsyncpa [#allocation8], 1 }
 0x136   :  { %468 = vsyncpa [#allocation6], 1 }
 0x137   :  { %469 = vsyncpa [#allocation11], 1 }

</bundles_post_ra>
